<compile_context>
chip_gen: v7x
topology: tpu7x:2x2x1
jax: 0.10.0
libtpu: 0.0.40
codegen_flags: <defaults>
</compile_context>

<pallas_src>
import functools
import math

import jax
import jax.numpy as jnp
from jax.experimental import pallas as pl
from jax.experimental.pallas import tpu as pltpu


def _round_up(x, m):
    return (x + m - 1) // m * m


def _pad_axis(a, axis, target):
    pad = target - a.shape[axis]
    if pad == 0:
        return a
    cfg = [(0, 0)] * a.ndim
    cfg[axis] = (0, pad)
    return jnp.pad(a, cfg)


# --------------------------------------------------------------------------------------
# Fused truncated-Krylov kernel:  out = sum_b (A_b @ X) @ W_b + bias
# grid = (M tiles, n_blocks, K tiles);  output / accumulators resident across (b, k).
# --------------------------------------------------------------------------------------
def _krylov_kernel(a_ref, x_ref, w_ref, bias_ref, out_ref, ax_acc, out_acc):
    b = pl.program_id(1)
    k = pl.program_id(2)
    nb = pl.num_programs(1)
    nk = pl.num_programs(2)

    @pl.when(jnp.logical_and(b == 0, k == 0))
    def _():
        out_acc[...] = jnp.zeros_like(out_acc)

    @pl.when(k == 0)
    def _():
        ax_acc[...] = jnp.zeros_like(ax_acc)

    # (TM, TK) @ (TK, in_f)  ->  accumulate A_b @ X for this row tile
    ax_acc[...] += jnp.dot(a_ref[...], x_ref[...],
                           preferred_element_type=jnp.float32)

    @pl.when(k == nk - 1)
    def _():
        # fold this block's contribution:  (TM, in_f) @ (in_f, out_fp)
        out_acc[...] += jnp.dot(ax_acc[...], w_ref[...],
                                preferred_element_type=jnp.float32)

    @pl.when(jnp.logical_and(b == nb - 1, k == nk - 1))
    def _():
        out_ref[...] = (out_acc[...] + bias_ref[...]).astype(out_ref.dtype)


def _krylov_matmul(a_stack, x, w_blocks, bias_row, *, tm=128, tk=128):
    """a_stack: (nb, Np, Np), x: (Np, in_f), w_blocks: (nb, in_f, out_fp),
    bias_row: (1, out_fp).  All dims already padded to tile multiples."""
    nb, np_, _ = a_stack.shape
    in_f = x.shape[1]
    out_fp = w_blocks.shape[2]
    grid = (np_ // tm, nb, np_ // tk)

    return pl.pallas_call(
        _krylov_kernel,
        out_shape=jax.ShapeDtypeStruct((np_, out_fp), jnp.float32),
        grid_spec=pltpu.PrefetchScalarGridSpec(
            num_scalar_prefetch=0,
            grid=grid,
            in_specs=[
                pl.BlockSpec((None, tm, tk), lambda m, b, k: (b, m, k)),
                pl.BlockSpec((tk, in_f), lambda m, b, k: (k, 0)),
                pl.BlockSpec((None, in_f, out_fp), lambda m, b, k: (b, 0, 0)),
                pl.BlockSpec((1, out_fp), lambda m, b, k: (0, 0)),
            ],
            out_specs=pl.BlockSpec((tm, out_fp), lambda m, b, k: (m, 0)),
            scratch_shapes=[
                pltpu.VMEM((tm, in_f), jnp.float32),
                pltpu.VMEM((tm, out_fp), jnp.float32),
            ],
        ),
        compiler_params=pltpu.CompilerParams(
            dimension_semantics=("parallel", "arbitrary", "arbitrary")),
    )(a_stack, x, w_blocks, bias_row)


# --------------------------------------------------------------------------------------
# Generic tiled matmul + bias kernel:  out = A @ B + bias
# (used for n_blocks==1, LIST_A_EXP_X_CAT, and the eye=False adjacency post-multiply)
# --------------------------------------------------------------------------------------
def _matmul_bias_kernel(a_ref, b_ref, bias_ref, out_ref, acc_ref):
    k = pl.program_id(1)

    @pl.when(k == 0)
    def _():
        acc_ref[...] = jnp.zeros_like(acc_ref)

    acc_ref[...] += jnp.dot(a_ref[...], b_ref[...],
                            preferred_element_type=jnp.float32)

    @pl.when(k == pl.num_programs(1) - 1)
    def _():
        out_ref[...] = (acc_ref[...] + bias_ref[...]).astype(out_ref.dtype)


def _matmul_bias(a, b, bias_row, *, tm=128, tk=128):
    m, kdim = a.shape
    out_fp = b.shape[1]
    grid = (m // tm, kdim // tk)

    return pl.pallas_call(
        _matmul_bias_kernel,
        out_shape=jax.ShapeDtypeStruct((m, out_fp), jnp.float32),
        grid_spec=pltpu.PrefetchScalarGridSpec(
            num_scalar_prefetch=0,
            grid=grid,
            in_specs=[
                pl.BlockSpec((tm, tk), lambda i, k: (i, k)),
                pl.BlockSpec((tk, out_fp), lambda i, k: (k, 0)),
                pl.BlockSpec((1, out_fp), lambda i, k: (0, 0)),
            ],
            out_specs=pl.BlockSpec((tm, out_fp), lambda i, k: (i, 0)),
            scratch_shapes=[pltpu.VMEM((tm, out_fp), jnp.float32)],
        ),
        compiler_params=pltpu.CompilerParams(
            dimension_semantics=("parallel", "arbitrary")),
    )(a, b, bias_row)


# --------------------------------------------------------------------------------------
# Forward wrapper mirroring truncated_krylov_layer.forward
# --------------------------------------------------------------------------------------
def truncated_krylov_forward(x, adj, shared_weight, output_bias,
                             list_a_exp=None, list_a_exp_x_cat=None,
                             eye=True, *, tm=128, tk=128):
    n, in_f = x.shape
    out_f = shared_weight.shape[1]
    n_blocks = shared_weight.shape[0] // in_f

    tile = math.lcm(tm, tk)
    np_ = _round_up(n, tile)
    out_fp = _round_up(out_f, 128)          # lane-dense output

    w = shared_weight.astype(jnp.float32)
    bias_row = _pad_axis(output_bias.reshape(1, out_f).astype(jnp.float32), 1, out_fp)
    zero_bias = jnp.zeros_like(bias_row)
    inner_bias = bias_row if eye else zero_bias

    if n_blocks == 1:
        kp = _round_up(in_f, tk)
        a_p = _pad_axis(_pad_axis(x.astype(jnp.float32), 0, np_), 1, kp)
        b_p = _pad_axis(_pad_axis(w, 0, kp), 1, out_fp)
        out = _matmul_bias(a_p, b_p, inner_bias, tm=tm, tk=tk)
    elif list_a_exp_x_cat is not None:
        cat = list_a_exp_x_cat.astype(jnp.float32)
        kp = _round_up(cat.shape[1], tk)
        a_p = _pad_axis(_pad_axis(cat, 0, np_), 1, kp)
        b_p = _pad_axis(_pad_axis(w, 0, kp), 1, out_fp)
        out = _matmul_bias(a_p, b_p, inner_bias, tm=tm, tk=tk)
    elif list_a_exp is not None:
        a_stack = jnp.stack([a.astype(jnp.float32) for a in list_a_exp], axis=0)
        a_stack = _pad_axis(_pad_axis(a_stack, 1, np_), 2, np_)
        x_p = _pad_axis(x.astype(jnp.float32), 0, np_)
        w_blocks = _pad_axis(w.reshape(n_blocks, in_f, out_f), 2, out_fp)
        out = _krylov_matmul(a_stack, x_p, w_blocks, inner_bias, tm=tm, tk=tk)
    else:
        raise ValueError("need n_blocks==1, LIST_A_EXP_X_CAT, or LIST_A_EXP")

    if not eye:
        adj_p = _pad_axis(_pad_axis(adj.astype(jnp.float32), 0, np_), 1, np_)
        out = _matmul_bias(adj_p, out, bias_row, tm=tm, tk=tk)

    return out[:n, :out_f]


# --------------------------------------------------------------------------------------
if __name__ == "__main__":
    N, in_features, out_features, n_blocks = 256, 64, 96, 3

    key = jax.random.PRNGKey(0)
    kx, ka, kw, kb = jax.random.split(key, 4)

    x = jax.random.normal(kx, (N, in_features), dtype=jnp.float32)

    # symmetric normalized adjacency with self-loops (deterministic)
    logits = jax.random.uniform(ka, (N, N))
    adj_bin = ((logits + logits.T) > 1.9).astype(jnp.float32)
    adj_bin = jnp.minimum(adj_bin + jnp.eye(N, dtype=jnp.float32), 1.0)
    d_inv_sqrt = 1.0 / jnp.sqrt(jnp.sum(adj_bin, axis=1))
    adj = adj_bin * d_inv_sqrt[:, None] * d_inv_sqrt[None, :]

    # LIST_A_EXP = [A, A^2, A^3]
    list_a_exp = []
    ap = adj
    for _ in range(n_blocks):
        list_a_exp.append(ap)
        ap = ap @ adj

    # parameters (uniform init as in reset_parameters)
    stdv_w = 1.0 / math.sqrt(out_features)
    stdv_b = 1.0 / math.sqrt(out_features)
    shared_weight = jax.random.uniform(
        kw, (in_features * n_blocks, out_features),
        minval=-stdv_w, maxval=stdv_w, dtype=jnp.float32)
    output_bias = jax.random.uniform(
        kb, (out_features,), minval=-stdv_b, maxval=stdv_b, dtype=jnp.float32)

    out_eye = truncated_krylov_forward(x, adj, shared_weight, output_bias,
                                       list_a_exp=list_a_exp, eye=True)
    out_noeye = truncated_krylov_forward(x, adj, shared_weight, output_bias,
                                         list_a_exp=list_a_exp, eye=False)
    out_eye, out_noeye = jax.block_until_ready((out_eye, out_noeye))

    # pure-JAX reference mirroring the PyTorch forward
    cat = jnp.concatenate([a @ x for a in list_a_exp], axis=1)
    ref_nobias = cat @ shared_weight
    ref_eye = ref_nobias + output_bias
    ref_noeye = adj @ ref_nobias + output_bias

    assert out_eye.shape == (N, out_features)
    assert out_noeye.shape == (N, out_features)
    assert jnp.allclose(out_eye, ref_eye, atol=1e-4, rtol=1e-4), "eye=True mismatch"
    assert jnp.allclose(out_noeye, ref_noeye, atol=1e-4, rtol=1e-4), "eye=False mismatch"
    print("KERNEL_OK")
</pallas_src>

<mosaic_0001>
module attributes {stable_mosaic.version = 11 : i64} {
  func.func @_krylov_kernel(%arg0: i32, %arg1: i32, %arg2: i32, %arg3: memref<1x128x128xf32, #tpu.memory_space<vmem>>, %arg4: memref<128x64xf32, #tpu.memory_space<vmem>>, %arg5: memref<1x64x128xf32, #tpu.memory_space<vmem>>, %arg6: memref<1x128xf32, #tpu.memory_space<vmem>>, %arg7: memref<128x128xf32, #tpu.memory_space<vmem>>, %arg8: memref<128x64xf32, #tpu.memory_space<vmem>>, %arg9: memref<128x128xf32, #tpu.memory_space<vmem>>) attributes {dimension_semantics = [#tpu.dimension_semantics<parallel>, #tpu.dimension_semantics<arbitrary>, #tpu.dimension_semantics<arbitrary>], iteration_bounds = array<i64: 2, 3, 2>, scalar_prefetch = 0 : i64, scratch_operands = 2 : i64, tpu.core_type = #tpu.core_type<tc>, window_params = [{transform_indices = @transform_0, window_bounds = array<i64: 1, 128, 128>}, {transform_indices = @transform_1, window_bounds = array<i64: 128, 64>}, {transform_indices = @transform_2, window_bounds = array<i64: 1, 64, 128>}, {pipeline_mode = #tpu.pipeline_mode<synchronous>, transform_indices = @transform_3, window_bounds = array<i64: 1, 128>}, {transform_indices = @transform_4, window_bounds = array<i64: 128, 128>}]} {
    %c0_i32 = arith.constant 0 : i32
    %0 = arith.cmpi eq, %arg1, %c0_i32 : i32
    %c0_i32_0 = arith.constant 0 : i32
    %1 = arith.cmpi eq, %arg2, %c0_i32_0 : i32
    %2 = arith.andi %0, %1 : i1
    %3 = arith.extui %2 : i1 to i32
    %c0_i32_1 = arith.constant 0 : i32
    %4 = arith.cmpi ne, %3, %c0_i32_1 : i32
    scf.if %4 {
      %cst_15 = arith.constant 0.000000e+00 : f32
      %23 = vector.broadcast %cst_15 : f32 to vector<128x128xf32>
      %c0_16 = arith.constant 0 : index
      %c0_17 = arith.constant 0 : index
      %24 = vector.load %arg9[%c0_16, %c0_17] : memref<128x128xf32, #tpu.memory_space<vmem>>, vector<128x128xf32>
      tpu.vector_store %arg9[%c0_16, %c0_17], %23 {strides = array<i32>} : memref<128x128xf32, #tpu.memory_space<vmem>>, vector<128x128xf32>,
    } else {
    }
    %c0_i32_2 = arith.constant 0 : i32
    %5 = arith.cmpi eq, %arg2, %c0_i32_2 : i32
    %6 = arith.extui %5 : i1 to i32
    %c0_i32_3 = arith.constant 0 : i32
    %7 = arith.cmpi ne, %6, %c0_i32_3 : i32
    scf.if %7 {
      %cst_15 = arith.constant 0.000000e+00 : f32
      %23 = vector.broadcast %cst_15 : f32 to vector<128x64xf32>
      %c0_16 = arith.constant 0 : index
      %c0_17 = arith.constant 0 : index
      %24 = vector.load %arg8[%c0_16, %c0_17] : memref<128x64xf32, #tpu.memory_space<vmem>>, vector<128x64xf32>
      tpu.vector_store %arg8[%c0_16, %c0_17], %23 {strides = array<i32>} : memref<128x64xf32, #tpu.memory_space<vmem>>, vector<128x64xf32>,
    } else {
    }
    %c0 = arith.constant 0 : index
    %c0_4 = arith.constant 0 : index
    %8 = vector.load %arg8[%c0, %c0_4] : memref<128x64xf32, #tpu.memory_space<vmem>>, vector<128x64xf32>
    %c0_5 = arith.constant 0 : index
    %c0_6 = arith.constant 0 : index
    %c0_7 = arith.constant 0 : index
    %9 = vector.load %arg3[%c0_5, %c0_6, %c0_7] : memref<1x128x128xf32, #tpu.memory_space<vmem>>, vector<1x128x128xf32>
    %10 = vector.shape_cast %9 : vector<1x128x128xf32> to vector<128x128xf32>
    %c0_8 = arith.constant 0 : index
    %c0_9 = arith.constant 0 : index
    %11 = vector.load %arg4[%c0_8, %c0_9] : memref<128x64xf32, #tpu.memory_space<vmem>>, vector<128x64xf32>
    %cst = arith.constant dense<0.000000e+00> : vector<128x64xf32>
    %12 = tpu.matmul %10, %11, %cst {dimension_numbers = #tpu.dot_dimension_numbers<[1], [0], [0], [1], [0, 0, 1, 1], [], []>} : vector<128x128xf32>, vector<128x64xf32>, vector<128x64xf32> -> vector<128x64xf32>
    %13 = arith.addf %8, %12 : vector<128x64xf32>
    %c0_10 = arith.constant 0 : index
    %c0_11 = arith.constant 0 : index
    %14 = vector.load %arg8[%c0_10, %c0_11] : memref<128x64xf32, #tpu.memory_space<vmem>>, vector<128x64xf32>
    tpu.vector_store %arg8[%c0_10, %c0_11], %13 {strides = array<i32>} : memref<128x64xf32, #tpu.memory_space<vmem>>, vector<128x64xf32>,
    %c1_i32 = arith.constant 1 : i32
    %15 = arith.cmpi eq, %arg2, %c1_i32 : i32
    %16 = arith.extui %15 : i1 to i32
    %c0_i32_12 = arith.constant 0 : i32
    %17 = arith.cmpi ne, %16, %c0_i32_12 : i32
    scf.if %17 {
      %c0_15 = arith.constant 0 : index
      %c0_16 = arith.constant 0 : index
      %23 = vector.load %arg9[%c0_15, %c0_16] : memref<128x128xf32, #tpu.memory_space<vmem>>, vector<128x128xf32>
      %c0_17 = arith.constant 0 : index
      %c0_18 = arith.constant 0 : index
      %24 = vector.load %arg8[%c0_17, %c0_18] : memref<128x64xf32, #tpu.memory_space<vmem>>, vector<128x64xf32>
      %c0_19 = arith.constant 0 : index
      %c0_20 = arith.constant 0 : index
      %c0_21 = arith.constant 0 : index
      %25 = vector.load %arg5[%c0_19, %c0_20, %c0_21] : memref<1x64x128xf32, #tpu.memory_space<vmem>>, vector<1x64x128xf32>
      %26 = vector.shape_cast %25 : vector<1x64x128xf32> to vector<64x128xf32>
      %cst_22 = arith.constant dense<0.000000e+00> : vector<128x128xf32>
      %27 = tpu.matmul %24, %26, %cst_22 {dimension_numbers = #tpu.dot_dimension_numbers<[1], [0], [0], [1], [0, 0, 1, 1], [], []>} : vector<128x64xf32>, vector<64x128xf32>, vector<128x128xf32> -> vector<128x128xf32>
      %28 = arith.addf %23, %27 : vector<128x128xf32>
      %c0_23 = arith.constant 0 : index
      %c0_24 = arith.constant 0 : index
      %29 = vector.load %arg9[%c0_23, %c0_24] : memref<128x128xf32, #tpu.memory_space<vmem>>, vector<128x128xf32>
      tpu.vector_store %arg9[%c0_23, %c0_24], %28 {strides = array<i32>} : memref<128x128xf32, #tpu.memory_space<vmem>>, vector<128x128xf32>,
    } else {
    }
    %c2_i32 = arith.constant 2 : i32
    %18 = arith.cmpi eq, %arg1, %c2_i32 : i32
    %c1_i32_13 = arith.constant 1 : i32
    %19 = arith.cmpi eq, %arg2, %c1_i32_13 : i32
    %20 = arith.andi %18, %19 : i1
    %21 = arith.extui %20 : i1 to i32
    %c0_i32_14 = arith.constant 0 : i32
    %22 = arith.cmpi ne, %21, %c0_i32_14 : i32
    scf.if %22 {
      %c0_15 = arith.constant 0 : index
      %c0_16 = arith.constant 0 : index
      %23 = vector.load %arg9[%c0_15, %c0_16] : memref<128x128xf32, #tpu.memory_space<vmem>>, vector<128x128xf32>
      %c0_17 = arith.constant 0 : index
      %c0_18 = arith.constant 0 : index
      %24 = vector.load %arg6[%c0_17, %c0_18] : memref<1x128xf32, #tpu.memory_space<vmem>>, vector<1x128xf32>
      %25 = vector.broadcast %24 : vector<1x128xf32> to vector<128x128xf32>
      %26 = arith.addf %23, %25 : vector<128x128xf32>
      %c0_19 = arith.constant 0 : index
      %c0_20 = arith.constant 0 : index
      %27 = vector.load %arg7[%c0_19, %c0_20] : memref<128x128xf32, #tpu.memory_space<vmem>>, vector<128x128xf32>
      tpu.vector_store %arg7[%c0_19, %c0_20], %26 {strides = array<i32>} : memref<128x128xf32, #tpu.memory_space<vmem>>, vector<128x128xf32>,
    } else {
    }
    return
  }
  func.func @transform_0(%arg0: i32, %arg1: i32, %arg2: i32) -> (i32, i32, i32) {
    %c0_i32 = arith.constant 0 : i32
    return %arg1, %arg0, %arg2 : i32, i32, i32
  }
  func.func @transform_1(%arg0: i32, %arg1: i32, %arg2: i32) -> (i32, i32) {
    %c0_i32 = arith.constant 0 : i32
    %c0_i32_0 = arith.constant 0 : i32
    return %arg2, %c0_i32 : i32, i32
  }
  func.func @transform_2(%arg0: i32, %arg1: i32, %arg2: i32) -> (i32, i32, i32) {
    %c0_i32 = arith.constant 0 : i32
    %c0_i32_0 = arith.constant 0 : i32
    %c0_i32_1 = arith.constant 0 : i32
    return %arg1, %c0_i32, %c0_i32_0 : i32, i32, i32
  }
  func.func @transform_3(%arg0: i32, %arg1: i32, %arg2: i32) -> (i32, i32) {
    %c0_i32 = arith.constant 0 : i32
    %c0_i32_0 = arith.constant 0 : i32
    %c0_i32_1 = arith.constant 0 : i32
    return %c0_i32, %c0_i32_0 : i32, i32
  }
  func.func @transform_4(%arg0: i32, %arg1: i32, %arg2: i32) -> (i32, i32) {
    %c0_i32 = arith.constant 0 : i32
    %c0_i32_0 = arith.constant 0 : i32
    return %arg0, %c0_i32 : i32, i32
  }
}

</mosaic_0001>

<bundles_post_ra>
// kernel: tpu_custom_call.1
= control target key start
LH: loop header
LB: loop body
LE: loop exit
PB: predicated region body
PF: predicated region fallthrough
CT: control target
= control target key end

     0   :  { %s2003_s0 = inlined_call_operand.hbm [shape: f32[3,256,256], index: 0, kind: input, shape index: {}]   ;;  %s2004_s1 = inlined_call_operand.vmem [shape: f32[256,64], index: 1, kind: input, shape index: {}]   ;;  %s2005_s2 = inlined_call_operand.vmem [shape: f32[3,64,128], index: 2, kind: input, shape index: {}]   ;;  %s2006_s3 = inlined_call_operand.vmem [shape: f32[1,128], index: 3, kind: input, shape index: {}]   ;;  %s2007_s4 = inlined_call_operand.hbm [shape: f32[256,128], index: 4, kind: output, shape index: {}]  }
   0x1   :  { %2017 = sst [smem:[#allocation17_spill]] %s2006_s3 }
   0x2   :  { %2018 = sst [smem:[#allocation18_spill]] %s2007_s4 }
   0x3   :  { %9 = vsyncpa [#allocation5], 0 }
   0x4   :  { %11 = vsyncpa [#allocation5 + $0x1], 0 }
   0x5   :  { %12 = vsyncpa [#allocation6], 0 }
   0x6   :  { %14 = vsyncpa [#allocation6 + $0x1], 0  ;;  %s1612_s15 = smov 0   ;;  %s1614_s16 = smov 0  }
   0x7   :  { %s1616_s17 = smov 0   ;;  %s1618_s18 = smov 0  }
   0x8   :  { %s1620_s19 = smov 0   ;;  %s1622_s20 = smov 0  }
   0x9   :  { %s1624_s21 = smov 0   ;;  %s1626_s22 = smov 0  }
   0xa   :  { %s1628_s23 = smov 0   ;;  %s1630_s24 = smov 0  }
   0xb   :  { %s1632_s25 = smov 0   ;;  %s1634_s26 = smov 0  }
   0xc   :  { %s1636_s27 = smov 0  }
   0xd LB: > { %2019 = sst [smem:[#allocation10_spill]] %s1528_s15  ;;  %s1016_s28 = sadd.s32 4294967295, %s1576_s27   ;;  %s1576_s27 = sphi %s1636_s27, %s20_s27   ;;  %s1572_s26 = sphi %s1634_s26, %s2055_s26   ;;  %s1568_s25 = sphi %s1632_s25, %s2054_s25   ;;  %s1564_s24 = sphi %s1630_s24, %s2053_s24   ;;  %s1560_s23 = sphi %s1628_s23, %s2052_s23   ;;  %s1556_s22 = sphi %s1626_s22, %s2051_s22   ;;  %s1552_s21 = sphi %s1624_s21, %s2050_s21   ;;  %s1548_s20 = sphi %s1622_s20, %s2049_s20   ;;  %s1544_s19 = sphi %s1620_s19, %s2048_s19   ;;  %s1540_s18 = sphi %s1618_s18, %s2047_s18   ;;  %s1536_s17 = sphi %s1616_s17, %s2046_s17   ;;  %s1532_s16 = sphi %s1614_s16, %s2045_s16   ;;  %s1528_s15 = sphi %s1612_s15, %s2044_s15  }
   0xe   : > { %2020 = sst [smem:[#allocation11_spill]] %s1560_s23  ;;  %s1017_s29 = sadd.s32 4294967294, %s1576_s27  }
   0xf   : > { %s32_s30 = sadd.s32 1, %s1564_s24  ;;  %s35_s5 = sadd.s32 1, %s1568_s25 }
  0x10   : > { %p33_p0 = scmp.ge.s32.totalorder %s32_s30, 2  ;;  %s39_s6 = sadd.s32 1, %s1572_s26 }
  0x11   : > { %p57_p1 = scmp.ne.s32.totalorder %s1548_s20, %s1544_s19  ;;  %p58_p2 = scmp.eq.s32.totalorder %s1576_s27, 0 }
  0x12   : > { %s2057_s30 = smov (%p33_p0, %s32_s30), 0  ;;  %s2059_s5 = smov (!%p33_p0, %s35_s5), %s1568_s25 }
  0x13   : > { %2021 = sst [smem:[#allocation12_spill]] %s2057_s30  ;;  %s46_s8 = ssub.s32 %s1564_s24, %s2057_s30 }
  0x14   : > { %p37_p3 = scmp.ge.s32.totalorder %s2059_s5, 3  ;;  %p63_p4 = scmp.ne.s32.totalorder %s1544_s19, %s1540_s18 }
  0x15   : > { %p1693_p5 = por %p58_p2, %p57_p1  ;;  %p64_p6 = scmp.eq.s32.totalorder %s1016_s28, 0 }
  0x16   : > { %s2061_s5 = smov (%p37_p3, %s2059_s5), 0  ;;  %s2063_s6 = smov (!%p37_p3, %s39_s6), %s1572_s26 }
  0x17   : > { %2023 = sst [smem:[#allocation13_spill]] %s2061_s5  ;;  %s43_s10 = ssub.s32 %s1568_s25, %s2061_s5 }
  0x18   : > { %p1702_p7 = por %p64_p6, %p63_p4  ;;  %p41_p8 = scmp.ge.s32.totalorder %s2063_s6, 2 }
  0x19   : > { %s149_s12 = sadd.s32 1, %s1536_s17  ;;  %p159_p9 = scmp.ne.s32.totalorder %s1536_s17, %s1532_s16 }
  0x1a   : > { %p160_p10 = scmp.eq.s32.totalorder %s1016_s28, 11  ;;  %s2065_s6 = smov (%p41_p8, %s2063_s6), 0 }
  0x1b   : > { %2025 = sst [smem:[#allocation14_spill]] %s2065_s6  ;;  %p165_p12 = scmp.ne.s32.totalorder %s1532_s16, %s1528_s15 }
  0x1c   : > { %p1711_p11 = por %p160_p10, %p159_p9  ;;  %s44_s14 = ssub.s32 %s1572_s26, %s2065_s6 }
  0x1d   : > { %p166_p13 = scmp.eq.s32.totalorder %s1017_s29, 11  ;;  %s45_s18 = sor.u32 %s44_s14, %s43_s10 }
  0x1e   : > { %s2026_s13 = scalar_select %p1711_p11, 1, 0 }
  0x1f   : > { %p147_p0 = scmp.eq.s32.totalorder %s44_s14, 0  ;;  %s47_s7 = sor.u32 %s46_s8, %s45_s18 }
  0x20   : > { %2027 = sst [smem:[#allocation15_spill]] %s2026_s13  ;;  %p1719_p1 = por %p166_p13, %p165_p12 }
  0x21   : > { %p48_p2 = scmp.eq.s32.totalorder %s47_s7, 0  ;;  %s2030_s30 = sadd.s32 1, %s1548_s20 }
  0x22   : > { %s2028_s5 = scalar_select %p1719_p1, 1, 0 }
  0x23   : > { %s1724_s28 = scalar_select %p147_p0, %s1536_s17, %s149_s12  }
  0x24   : > { %2029 = sst [smem:[#allocation16_spill]] %s2028_s5  ;;  %p1295_p3 = scmp.lt.s32.totalorder %s1576_s27, 12 }
  0x25   : > { %s1729_s4 = scalar_select %p48_p2, %s1548_s20, %s2030_s30  }
  0x26   : > { %s189_s13 = sand.u32 1, %s1548_s20   ;;  %s1056_s15 = sshll.u32 %s1572_s26, 5 }
  0x27   : > { %s1020_s23 = sshll.u32 %s189_s13, 7  ;;  %s199_s6 = sadd.s32 %s1564_s24, %s1056_s15 }
  0x28   : > { %s1023_s29 = sshll.u32 %s1568_s25, 6  ;;  %s193_s14 = scalar_lea.vmem [#allocation4], %s1020_s23 }
  0x29   : > { %s201_s10 = sadd.s32 %s1023_s29, %s199_s6  ;;  %s204_s8 = sshll.u32 %s193_s14, 4  ;;  %s1736_s8 = int_to_ptr.vmem [resolvable:$true] %s204_s8 }
  0x2a   : > { %s1024_s18 = sshll.u32 %s201_s10, 7  ;;  %p1745_p4 = pnand %p1295_p3, %p1693_p5 }
  0x2b   : > { %s1741_s7 = scalar_lea.hbm %s2003_s0, %s1024_s18  ;;  %s1749_s15 = scalar_lea.sflag [#allocation5], %s189_s13 }
  0x2c   : > { %s1408_s23 = scalar_lea.hbm %s1741_s7, 2048  ;;  %p1410_p8 = pneg %p1745_p4 }
  0x2d   : > { %p1409_p6 = scmp.ne.s32.totalorder %s1741_s7, %s1408_s23  ;;  %s1413_s6 = scalar_lea.hbm %s2003_s0, 24576 }
  0x2e   : > { %p1414_p5 = scmp.lt.u32.totalorder %s1741_s7, %s2003_s0  ;;  %p1415_p12 = scmp.lt.u32.totalorder %s1413_s6, %s1408_s23 }
  0x2f   : > { %p1411_p9 = pnand %p1410_p8, %p1409_p6  ;;  %p1417_p0 = scmp.lt.u32.totalorder %s1408_s23, %s1741_s7 }
  0x30   : > { %p1416_p13 = por %p1415_p12, %p1414_p5 }
  0x31   : > { %p1412_p10 = pneg %p1411_p9 }
  0x32   : > { %p1418_p2 = por %p1417_p0, %p1416_p13 }
  0x34   : > { %p1419_p3 = pnand %p1418_p2, %p1412_p10 }
  0x36   : > { %1422 = shalt.err (!%p1419_p3)
}
  0x37   : > { %s1423_s13 = scalar_lea.vmem %s1736_s8, 2048  ;;  %s1578_s29 = smov [#allocation4]  }
  0x38   : > { %p1424_p6 = scmp.ne.s32.totalorder %s1736_s8, %s1423_s13  ;;  %s1428_s10 = sshll.u32 %s1578_s29, 4  ;;  %s1429_s10 = int_to_ptr.vmem [resolvable:$false] %s1428_s10 }
  0x39   : > { %s1430_s14 = scalar_lea.vmem %s1429_s10, 4096  ;;  %p1431_p11 = scmp.lt.s32.totalorder %s1736_s8, %s1429_s10 }
  0x3a   : > { %p1426_p9 = pnand %p1424_p6, %p1410_p8  ;;  %p1432_p5 = scmp.lt.s32.totalorder %s1430_s14, %s1423_s13 }
  0x3c   : > { %p1427_p1 = pneg %p1426_p9  ;;  %p1433_p12 = por %p1432_p5, %p1431_p11 }
  0x3e   : > { %p1434_p13 = pnand %p1433_p12, %p1427_p1 }
  0x40   : > { %1437 = shalt.err (!%p1434_p13)
}
  0x41   : > { %s1579_s18 = smov 256   ;;  %s1580_s23 = smov 128  }
  0x42   : > { %s1581_s3 = smov 8   ;;  %p1025_p8 = scmp.ge.s32.totalorder %s1576_s27, 1 }
  0x43   : > { %1290 = dma.hbm_to_vmem [thread:$0]  (!%p1745_p4), %s1741_s7, 2048, %s1736_s8, %s1749_s15, %s1579_s18, %s1580_s23, %s1581_s3  }
  0x44   : > { %p229_p10 = scmp.lt.s32.totalorder %s1576_s27, 13 }
  0x46   : > { %p230_p0 = pnand %p1025_p8, %p229_p10 }
  0x47   : > { %s235_s5 = sand.u32 (!%p230_p0), 1, %s1544_s19  }
  0x48   : > { %233 = sbr.rel (%p230_p0) target bundleno = 641 (0x281), region = 36  ;;  %s1026_s6 = sshll.u32 (!%p230_p0), %s235_s5, 7 }
  0x49   : > { %s236_s9 = scalar_lea.sflag (!%p230_p0), [#allocation5], %s235_s5  ;;  %s1780_s12 = scalar_lea.vmem (!%p230_p0), [#allocation4], %s1026_s6 }
  0x4f   : > { %1519 = dma.done.wait (%p1702_p7), %s236_s9, 2048  }
  0x50   : > { %1521 = vsyncadd (%p1702_p7), %s236_s9, 4294965248  ;;  %s271_s8 = sand.u32 1, %s1532_s16   ;;  %s1028_s7 = sshll.u32 %s1552_s21, 4 }
  0x51   : > { %s1027_s30 = sshll.u32 %s271_s8, 7  ;;  %p276_p11 = scmp.lt.s32.totalorder %s1028_s7, 31 }
  0x52   : > { %p281_p1 = scmp.lt.s32.totalorder %s1556_s22, 2  ;;  %p287_p4 = scmp.eq.s32.totalorder %s1556_s22, 0 }
  0x53   : > { %s2067_s7 = smov (!%p276_p11, %s1028_s7), 31  ;;  %p288_p7 = scmp.eq.s32.totalorder %s1552_s21, 0 }
  0x54   : > { %s282_s15 = scalar_select %p281_p1, %s1556_s22, 2 }
  0x55   : > { %s1029_s13 = sshll.u32 %s2067_s7, 3  ;;  %p289_p2 = pnand %p288_p7, %p287_p4 }
  0x56   : > { %s1796_s10 = scalar_lea.vmem %s2004_s1, %s1029_s13  ;;  %s1057_s14 = sshll.u32 %s282_s15, 6  ;;  %v1582_v0 = vmov (!%p289_p2), 0.0  }
  0x57   : > { %s1801_s3 = scalar_lea.vmem %s2005_s2, %s1057_s14  ;;  %s1804_s5 = scalar_lea.vmem [#allocation7], %s1027_s30  ;;  %293 = vst [vmem:[#allocation3] sm:$0xff] (!%p289_p2), %v1582_v0  ;;  %294 = vst [vmem:[#allocation3 + $0x8] sm:$0xff] (!%p289_p2), %v1582_v0 }
  0x58   : > { %292 = sbr.rel (%p289_p2) target bundleno = 95 (0x5f), region = 44  ;;  %295 = vst [vmem:[#allocation3 + $0x10] sm:$0xff] (!%p289_p2), %v1582_v0  ;;  %296 = vst [vmem:[#allocation3 + $0x18] sm:$0xff] (!%p289_p2), %v1582_v0 }
  0x59   : > { %297 = vst [vmem:[#allocation3 + $0x20] sm:$0xff] (!%p289_p2), %v1582_v0  ;;  %298 = vst [vmem:[#allocation3 + $0x28] sm:$0xff] (!%p289_p2), %v1582_v0 }
  0x5a   : > { %299 = vst [vmem:[#allocation3 + $0x30] sm:$0xff] (!%p289_p2), %v1582_v0  ;;  %300 = vst [vmem:[#allocation3 + $0x38] sm:$0xff] (!%p289_p2), %v1582_v0 }
  0x5b   : > { %301 = vst [vmem:[#allocation3 + $0x40] sm:$0xff] (!%p289_p2), %v1582_v0  ;;  %302 = vst [vmem:[#allocation3 + $0x48] sm:$0xff] (!%p289_p2), %v1582_v0 }
  0x5c   : > { %303 = vst [vmem:[#allocation3 + $0x50] sm:$0xff] (!%p289_p2), %v1582_v0  ;;  %304 = vst [vmem:[#allocation3 + $0x58] sm:$0xff] (!%p289_p2), %v1582_v0 }
  0x5d   : > { %305 = vst [vmem:[#allocation3 + $0x60] sm:$0xff] (!%p289_p2), %v1582_v0  ;;  %306 = vst [vmem:[#allocation3 + $0x68] sm:$0xff] (!%p289_p2), %v1582_v0 }
  0x5e   : > { %307 = vst [vmem:[#allocation3 + $0x70] sm:$0xff] (!%p289_p2), %v1582_v0  ;;  %308 = vst [vmem:[#allocation3 + $0x78] sm:$0xff] (!%p289_p2), %v1582_v0 }
  0x5f PF: > { %p1032_p3 = scmp.ne.s32.totalorder %s1552_s21, 0 }
  0x60   : > { %vm312_vm0 = vcmask (!%p1032_p3), 523264   ;;  %v1583_v1 = vmov (!%p1032_p3), 0.0  }
  0x61   : > { %311 = sbr.rel (%p1032_p3) target bundleno = 105 (0x69), region = 48  ;;  %313 = vst.msk [vmem:[#allocation2] sm:$0xff] (!%p1032_p3), %vm312_vm0, %v1583_v1  ;;  %314 = vst.msk [vmem:[#allocation2 + $0x8] sm:$0xff] (!%p1032_p3), %vm312_vm0, %v1583_v1 }
  0x62   : > { %315 = vst.msk [vmem:[#allocation2 + $0x10] sm:$0xff] (!%p1032_p3), %vm312_vm0, %v1583_v1  ;;  %316 = vst.msk [vmem:[#allocation2 + $0x18] sm:$0xff] (!%p1032_p3), %vm312_vm0, %v1583_v1 }
  0x63   : > { %317 = vst.msk [vmem:[#allocation2 + $0x20] sm:$0xff] (!%p1032_p3), %vm312_vm0, %v1583_v1  ;;  %318 = vst.msk [vmem:[#allocation2 + $0x28] sm:$0xff] (!%p1032_p3), %vm312_vm0, %v1583_v1 }
  0x64   : > { %319 = vst.msk [vmem:[#allocation2 + $0x30] sm:$0xff] (!%p1032_p3), %vm312_vm0, %v1583_v1  ;;  %320 = vst.msk [vmem:[#allocation2 + $0x38] sm:$0xff] (!%p1032_p3), %vm312_vm0, %v1583_v1 }
  0x65   : > { %321 = vst.msk [vmem:[#allocation2 + $0x40] sm:$0xff] (!%p1032_p3), %vm312_vm0, %v1583_v1  ;;  %322 = vst.msk [vmem:[#allocation2 + $0x48] sm:$0xff] (!%p1032_p3), %vm312_vm0, %v1583_v1 }
  0x66   : > { %323 = vst.msk [vmem:[#allocation2 + $0x50] sm:$0xff] (!%p1032_p3), %vm312_vm0, %v1583_v1  ;;  %324 = vst.msk [vmem:[#allocation2 + $0x58] sm:$0xff] (!%p1032_p3), %vm312_vm0, %v1583_v1 }
  0x67   : > { %325 = vst.msk [vmem:[#allocation2 + $0x60] sm:$0xff] (!%p1032_p3), %vm312_vm0, %v1583_v1  ;;  %326 = vst.msk [vmem:[#allocation2 + $0x68] sm:$0xff] (!%p1032_p3), %vm312_vm0, %v1583_v1 }
  0x68   : > { %327 = vst.msk [vmem:[#allocation2 + $0x70] sm:$0xff] %vm312_vm0, %v1583_v1  ;;  %328 = vst.msk [vmem:[#allocation2 + $0x78] sm:$0xff] %vm312_vm0, %v1583_v1 }
  0x69 PF: > { %v361_v2 = vld [vmem:[%s1796_s10] sm:$0xff]  ;;  %v362_v3 = vld [vmem:[%s1796_s10 + $0x8] sm:$0xff]  ;;  %v363_v4 = vld [vmem:[%s1796_s10 + $0x10] sm:$0xff]  ;;  %p555_p6 = scmp.eq.s32.totalorder %s1552_s21, 1  ;;  %vm538_vm1 = vcmask 523264   ;;  %p1033_p9 = scmp.ne.s32.totalorder %s1552_s21, 1 }
  0x6a   : > { %v1211_v5 = vpack.c.bf16 %v362_v3, %v361_v2  ;;  %v364_v6 = vld [vmem:[%s1796_s10 + $0x18] sm:$0xff]  ;;  %v365_v8 = vld [vmem:[%s1796_s10 + $0x20] sm:$0xff]  ;;  %v366_v9 = vld [vmem:[%s1796_s10 + $0x28] sm:$0xff] }
  0x6b   : > { %v1215_v7 = vpack.c.bf16 %v364_v6, %v363_v4  ;;  %v1219_v10 = vpack.c.bf16 %v366_v9, %v365_v8  ;;  %v345_v11 = vld [vmem:[%s1780_s12] sm:$0xff]  ;;  %v367_v13 = vld [vmem:[%s1796_s10 + $0x30] sm:$0xff]  ;;  %v368_v14 = vld [vmem:[%s1796_s10 + $0x38] sm:$0xff] }
  0x6c   : > { %1212 = vmatprep.subr.bf16.mxu0 %v1211_v5  ;;  %1259 = vmatprep.subr.bf16.mxu1 %v1211_v5  ;;  %v353_v12 = vld [vmem:[%s1780_s12 + $0x40] sm:$0xff]  ;;  %v1223_v15 = vpack.c.bf16 %v368_v14, %v367_v13  ;;  %v370_v17 = vld [vmem:[%s1796_s10 + $0x48] sm:$0xff]  ;;  %v371_v19 = vld [vmem:[%s1796_s10 + $0x50] sm:$0xff] }
  0x6d   : > { %1214 = vmatpush3.bf16.msra.mxu0 %v1211_v5  ;;  %1267 = vmatpush3.bf16.msra.mxu1 %v1211_v5  ;;  %v369_v16 = vld [vmem:[%s1796_s10 + $0x40] sm:$0xff]  ;;  %v372_v20 = vld [vmem:[%s1796_s10 + $0x58] sm:$0xff]  ;;  %v374_v23 = vld [vmem:[%s1796_s10 + $0x68] sm:$0xff] }
  0x6e   : > { %1216 = vmatprep.subr.bf16.mxu0 %v1215_v7  ;;  %1260 = vmatprep.subr.bf16.mxu1 %v1215_v7  ;;  %v1227_v18 = vpack.c.bf16 %v370_v17, %v369_v16  ;;  %v1231_v21 = vpack.c.bf16 %v372_v20, %v371_v19  ;;  %v373_v22 = vld [vmem:[%s1796_s10 + $0x60] sm:$0xff]  ;;  %v375_v25 = vld [vmem:[%s1796_s10 + $0x70] sm:$0xff]  ;;  %v376_v26 = vld [vmem:[%s1796_s10 + $0x78] sm:$0xff] }
  0x6f   : > { %1147 = vmatprep.mubr.f32.mxu0 %v345_v11  ;;  %1159 = vmatprep.mubr.f32.mxu1 %v353_v12  ;;  %v1235_v24 = vpack.c.bf16 %v374_v23, %v373_v22  ;;  %v1239_v27 = vpack.c.bf16 %v376_v26, %v375_v25  ;;  %v346_v28 = vld [vmem:[%s1780_s12 + $0x8] sm:$0xff]  ;;  %v347_v30 = vld [vmem:[%s1780_s12 + $0x10] sm:$0xff]  ;;  %v348_v32 = vld [vmem:[%s1780_s12 + $0x18] sm:$0xff] }
  0x70   : > { %v354_v29 = vld [vmem:[%s1780_s12 + $0x48] sm:$0xff]  ;;  %v355_v31 = vld [vmem:[%s1780_s12 + $0x50] sm:$0xff]  ;;  %v356_v33 = vld [vmem:[%s1780_s12 + $0x58] sm:$0xff] }
  0x71   : > { %1218 = vmatpush3.bf16.msra.mxu0 %v1215_v7  ;;  %1268 = vmatpush3.bf16.msra.mxu1 %v1215_v7  ;;  %v349_v34 = vld [vmem:[%s1780_s12 + $0x20] sm:$0xff]  ;;  %v350_v36 = vld [vmem:[%s1780_s12 + $0x28] sm:$0xff]  ;;  %v351_v38 = vld [vmem:[%s1780_s12 + $0x30] sm:$0xff] }
  0x72   : > { %1220 = vmatprep.subr.bf16.mxu0 %v1219_v10  ;;  %1261 = vmatprep.subr.bf16.mxu1 %v1219_v10  ;;  %v357_v35 = vld [vmem:[%s1780_s12 + $0x60] sm:$0xff]  ;;  %v358_v37 = vld [vmem:[%s1780_s12 + $0x68] sm:$0xff]  ;;  %v359_v39 = vld [vmem:[%s1780_s12 + $0x70] sm:$0xff] }
  0x73   : > { %v352_v40 = vld [vmem:[%s1780_s12 + $0x38] sm:$0xff]  ;;  %v330_v42 = vld [vmem:[#allocation2 + $0x8] sm:$0xff]  ;;  %v329_v44 = vld [vmem:[#allocation2] sm:$0xff] }
  0x74   : > { %v360_v41 = vld [vmem:[%s1780_s12 + $0x78] sm:$0xff]  ;;  %v338_v43 = vld [vmem:[#allocation2 + $0x48] sm:$0xff]  ;;  %v337_v45 = vld [vmem:[#allocation2 + $0x40] sm:$0xff] }
  0x75   : > { %1222 = vmatpush3.bf16.msra.mxu0 %v1219_v10  ;;  %1269 = vmatpush3.bf16.msra.mxu1 %v1219_v10  ;;  %v332_v54 = vld [vmem:[#allocation2 + $0x18] sm:$0xff]  ;;  %v331_v56 = vld [vmem:[#allocation2 + $0x10] sm:$0xff]  ;;  %v334_v2 = vld [vmem:[#allocation2 + $0x28] sm:$0xff] }
  0x76   : > { %1224 = vmatprep.subr.bf16.mxu0 %v1223_v15  ;;  %1262 = vmatprep.subr.bf16.mxu1 %v1223_v15  ;;  %v340_v55 = vld [vmem:[#allocation2 + $0x58] sm:$0xff]  ;;  %v339_v57 = vld [vmem:[#allocation2 + $0x50] sm:$0xff]  ;;  %v342_v3 = vld [vmem:[#allocation2 + $0x68] sm:$0xff] }
  0x77   : > { %v333_v4 = vld [vmem:[#allocation2 + $0x20] sm:$0xff]  ;;  %v336_v14 = vld [vmem:[#allocation2 + $0x38] sm:$0xff]  ;;  %v335_v16 = vld [vmem:[#allocation2 + $0x30] sm:$0xff] }
  0x78   : > { %v341_v5 = vld [vmem:[#allocation2 + $0x60] sm:$0xff]  ;;  %v343_v17 = vld [vmem:[#allocation2 + $0x70] sm:$0xff] }
  0x79   : > { %1226 = vmatpush3.bf16.msra.mxu0 %v1223_v15  ;;  %1270 = vmatpush3.bf16.msra.mxu1 %v1223_v15  ;;  %v344_v15 = vld [vmem:[#allocation2 + $0x78] sm:$0xff]  ;;  %v591_v26 = vld [vmem:[%s1801_s3] sm:$0xff] (!%p1033_p9) }
  0x7a   : > { %1228 = vmatprep.subr.bf16.mxu0 %v1227_v18  ;;  %1263 = vmatprep.subr.bf16.mxu1 %v1227_v18 }
  0x7d   : > { %1230 = vmatpush3.bf16.msra.mxu0 %v1227_v18  ;;  %1271 = vmatpush3.bf16.msra.mxu1 %v1227_v18 }
  0x7e   : > { %1232 = vmatprep.subr.bf16.mxu0 %v1231_v21  ;;  %1264 = vmatprep.subr.bf16.mxu1 %v1231_v21 }
  0x81   : > { %1234 = vmatpush3.bf16.msra.mxu0 %v1231_v21  ;;  %1272 = vmatpush3.bf16.msra.mxu1 %v1231_v21 }
  0x82   : > { %1236 = vmatprep.subr.bf16.mxu0 %v1235_v24  ;;  %1265 = vmatprep.subr.bf16.mxu1 %v1235_v24 }
  0x85   : > { %1238 = vmatpush3.bf16.msra.mxu0 %v1235_v24  ;;  %1273 = vmatpush3.bf16.msra.mxu1 %v1235_v24 }
  0x86   : > { %1240 = vmatprep.subr.bf16.mxu0 %v1239_v27  ;;  %1266 = vmatprep.subr.bf16.mxu1 %v1239_v27 }
  0x89   : > { %1242 = vmatpush3.bf16.msra.mxu0 %v1239_v27  ;;  %1274 = vmatpush3.bf16.msra.mxu1 %v1239_v27  ;;  %v592_v27 = vld [vmem:[%s1801_s3 + $0x8] sm:$0xff] (!%p1033_p9) }
  0x8c   : > { %1148 = vmatmul.mubr.f32.vlgmr.msra.gmra.mrb[0].mxu0 %v346_v28  ;;  %1160 = vmatmul.mubr.f32.vlgmr.msra.gmra.mrb[0].mxu1 %v354_v29  ;;  %v593_v28 = vld [vmem:[%s1801_s3 + $0x10] sm:$0xff] (!%p1033_p9)  ;;  %v1243_v29 = vpack.c.bf16 (!%p1033_p9), %v592_v27, %v591_v26  ;;  %v566_v26 = vld [vmem:[#allocation3 + $0x38] sm:$0xff] (!%p1033_p9) }
  0x8d   : > { %1150 = vmatprep.mubr.f32.mxu0 %v347_v30  ;;  %1162 = vmatprep.mubr.f32.mxu1 %v355_v31  ;;  %v594_v30 = vld [vmem:[%s1801_s3 + $0x18] sm:$0xff] (!%p1033_p9) }
  0x8e   : > { %v1247_v31 = vpack.c.bf16 (!%p1033_p9), %v594_v30, %v593_v28  ;;  %1244 = vmatprep.subr.bf16.mxu0 (!%p1033_p9), %v1243_v29  ;;  %1275 = vmatprep.subr.bf16.mxu1 (!%p1033_p9), %v1243_v29  ;;  %v574_v27 = vld [vmem:[#allocation3 + $0x78] sm:$0xff] (!%p1033_p9)  ;;  %v565_v28 = vld [vmem:[#allocation3 + $0x30] sm:$0xff] (!%p1033_p9) }
  0x8f   : > { %1246 = vmatpush3.bf16.msra.mxu0 (!%p1033_p9), %v1243_v29  ;;  %1279 = vmatpush3.bf16.msra.mxu1 (!%p1033_p9), %v1243_v29  ;;  %v573_v29 = vld [vmem:[#allocation3 + $0x70] sm:$0xff] (!%p1033_p9) }
  0x90   : > { %1151 = vmatmul.mubr.f32.gmra.mrb[2].mxu0 %v348_v32  ;;  %1163 = vmatmul.mubr.f32.gmra.mrb[2].mxu1 %v356_v33  ;;  %v595_v32 = vld [vmem:[%s1801_s3 + $0x20] sm:$0xff] (!%p1033_p9)  ;;  %v596_v33 = vld [vmem:[%s1801_s3 + $0x28] sm:$0xff] (!%p1033_p9) }
  0x91   : > { %1153 = vmatprep.mubr.f32.mxu0 %v349_v34  ;;  %1165 = vmatprep.mubr.f32.mxu1 %v357_v35 }
  0x92   : > { %1248 = vmatprep.subr.bf16.mxu0 (!%p1033_p9), %v1247_v31  ;;  %1276 = vmatprep.subr.bf16.mxu1 (!%p1033_p9), %v1247_v31 }
  0x93   : > { %1250 = vmatpush3.bf16.msra.mxu0 (!%p1033_p9), %v1247_v31  ;;  %1280 = vmatpush3.bf16.msra.mxu1 (!%p1033_p9), %v1247_v31 }
  0x94   : > { %1154 = vmatmul.mubr.f32.gmra.mrb[4].mxu0 %v350_v36  ;;  %1166 = vmatmul.mubr.f32.gmra.mrb[4].mxu1 %v358_v37  ;;  %v1251_v36 = vpack.c.bf16 (!%p1033_p9), %v596_v33, %v595_v32  ;;  %v597_v37 = vld [vmem:[%s1801_s3 + $0x30] sm:$0xff] (!%p1033_p9) }
  0x95   : > { %1156 = vmatprep.mubr.f32.mxu0 %v351_v38  ;;  %1168 = vmatprep.mubr.f32.mxu1 %v359_v39  ;;  %v598_v38 = vld [vmem:[%s1801_s3 + $0x38] sm:$0xff] (!%p1033_p9) }
  0x96   : > { %1252 = vmatprep.subr.bf16.mxu0 (!%p1033_p9), %v1251_v36  ;;  %1277 = vmatprep.subr.bf16.mxu1 (!%p1033_p9), %v1251_v36  ;;  %v1255_v39 = vpack.c.bf16 (!%p1033_p9), %v598_v38, %v597_v37 }
  0x97   : > { %1254 = vmatpush3.bf16.msra.mxu0 (!%p1033_p9), %v1251_v36  ;;  %1281 = vmatpush3.bf16.msra.mxu1 (!%p1033_p9), %v1251_v36 }
  0x98   : > { %1157 = vmatmul.mubr.f32.gmra.mrb[6].mxu0 %v352_v40  ;;  %1169 = vmatmul.mubr.f32.gmra.mrb[6].mxu1 %v360_v41 }
  0x99   : > { %1256 = vmatprep.subr.bf16.mxu0 (!%p1033_p9), %v1255_v39  ;;  %1278 = vmatprep.subr.bf16.mxu1 (!%p1033_p9), %v1255_v39 }
  0x9b   : > { %1258 = vmatpush3.bf16.msra.mxu0 (!%p1033_p9), %v1255_v39  ;;  %1282 = vmatpush3.bf16.msra.mxu1 (!%p1033_p9), %v1255_v39 }
 0x15f   : > { %v1149_v46 = vpop.f32.mrb[0].mxu0  ;;  %v1161_v47 = vpop.f32.mrb[0].mxu1 }
 0x160   : > { %v523_v48 = vadd.f32 %v1149_v46, %v330_v42  ;;  %v531_v49 = vadd.f32 %v1161_v47, %v338_v43  ;;  %v443_v50 = vpop.f32.mrb[1].mxu0  ;;  %v483_v51 = vpop.f32.mrb[1].mxu1 }
 0x161   : > { %v522_v52 = vadd.f32 %v443_v50, %v329_v44  ;;  %v530_v53 = vadd.f32 %v483_v51, %v337_v45 }
 0x162   : > { %540 = vst.msk [vmem:[#allocation2 + $0x8] sm:$0xff] %vm538_vm1, %v523_v48  ;;  %548 = vst.msk [vmem:[#allocation2 + $0x48] sm:$0xff] %vm538_vm1, %v531_v49 }
 0x163   : > { %539 = vst.msk [vmem:[#allocation2] sm:$0xff] %vm538_vm1, %v522_v52  ;;  %547 = vst.msk [vmem:[#allocation2 + $0x40] sm:$0xff] %vm538_vm1, %v530_v53  ;;  %v1152_v58 = vpop.f32.mrb[2].mxu0  ;;  %v1164_v59 = vpop.f32.mrb[2].mxu1 }
 0x164   : > { %v525_v60 = vadd.f32 %v1152_v58, %v332_v54  ;;  %v533_v61 = vadd.f32 %v1164_v59, %v340_v55  ;;  %v453_v62 = vpop.f32.mrb[3].mxu0  ;;  %v493_v63 = vpop.f32.mrb[3].mxu1  ;;  %v560_v54 = vld [vmem:[#allocation3 + $0x8] sm:$0xff] (!%p1033_p9) }
 0x165   : > { %v524_v0 = vadd.f32 %v453_v62, %v331_v56  ;;  %v532_v1 = vadd.f32 %v493_v63, %v339_v57  ;;  %v568_v55 = vld [vmem:[#allocation3 + $0x48] sm:$0xff] (!%p1033_p9)  ;;  %v559_v56 = vld [vmem:[#allocation3] sm:$0xff] (!%p1033_p9) }
 0x166   : > { %542 = vst.msk [vmem:[#allocation2 + $0x18] sm:$0xff] %vm538_vm1, %v525_v60  ;;  %550 = vst.msk [vmem:[#allocation2 + $0x58] sm:$0xff] %vm538_vm1, %v533_v61  ;;  %v567_v57 = vld [vmem:[#allocation3 + $0x40] sm:$0xff] (!%p1033_p9) }
 0x167   : > { %541 = vst.msk [vmem:[#allocation2 + $0x10] sm:$0xff] %vm538_vm1, %v524_v0  ;;  %549 = vst.msk [vmem:[#allocation2 + $0x50] sm:$0xff] %vm538_vm1, %v532_v1  ;;  %v1155_v6 = vpop.f32.mrb[4].mxu0  ;;  %v1167_v7 = vpop.f32.mrb[4].mxu1 }
 0x168   : > { %v527_v8 = vadd.f32 %v1155_v6, %v334_v2  ;;  %v535_v9 = vadd.f32 %v1167_v7, %v342_v3  ;;  %v463_v10 = vpop.f32.mrb[5].mxu0  ;;  %v503_v11 = vpop.f32.mrb[5].mxu1  ;;  %v562_v2 = vld [vmem:[#allocation3 + $0x18] sm:$0xff] (!%p1033_p9) }
 0x169   : > { %v526_v12 = vadd.f32 %v463_v10, %v333_v4  ;;  %v534_v13 = vadd.f32 %v503_v11, %v341_v5  ;;  %558 = sbr.rel (%p1033_p9) target bundleno = 593 (0x251), region = 52  ;;  %v576_v40 = vld [vmem:[#allocation2 + $0x8] sm:$0xff] (!%p1033_p9)  ;;  %v570_v3 = vld [vmem:[#allocation3 + $0x58] sm:$0xff] (!%p1033_p9)  ;;  %v561_v4 = vld [vmem:[#allocation3 + $0x10] sm:$0xff] (!%p1033_p9) }
 0x16a   : > { %544 = vst.msk [vmem:[#allocation2 + $0x28] sm:$0xff] %vm538_vm1, %v527_v8  ;;  %552 = vst.msk [vmem:[#allocation2 + $0x68] sm:$0xff] %vm538_vm1, %v535_v9  ;;  %v575_v34 = vld [vmem:[#allocation2] sm:$0xff] (!%p1033_p9)  ;;  %v584_v41 = vld [vmem:[#allocation2 + $0x48] sm:$0xff] (!%p1033_p9) }
 0x16b   : > { %543 = vst.msk [vmem:[#allocation2 + $0x20] sm:$0xff] %vm538_vm1, %v526_v12  ;;  %551 = vst.msk [vmem:[#allocation2 + $0x60] sm:$0xff] %vm538_vm1, %v534_v13  ;;  %v1158_v18 = vpop.f32.mrb[6].mxu0  ;;  %v1170_v19 = vpop.f32.mrb[6].mxu1  ;;  %v583_v35 = vld [vmem:[#allocation2 + $0x40] sm:$0xff] (!%p1033_p9)  ;;  %1187 = vmatprep.mubr.msk.f32.mxu0 (!%p1033_p9), %vm538_vm1, %v575_v34  ;;  %v569_v5 = vld [vmem:[#allocation3 + $0x50] sm:$0xff] (!%p1033_p9) }
 0x16c   : > { %v529_v20 = vadd.f32 %v1158_v18, %v336_v14  ;;  %v537_v21 = vadd.f32 %v1170_v19, %v344_v15  ;;  %v473_v22 = vpop.f32.mrb[7].mxu0  ;;  %v513_v23 = vpop.f32.mrb[7].mxu1  ;;  %1199 = vmatprep.mubr.msk.f32.mxu1 (!%p1033_p9), %vm538_vm1, %v583_v35  ;;  %1188 = vmatmul.mubr.msk.f32.vlgmr.msra.gmra.mrb[0].mxu0 (!%p1033_p9), %vm538_vm1, %v576_v40  ;;  %v564_v14 = vld [vmem:[#allocation3 + $0x28] sm:$0xff] (!%p1033_p9) }
 0x16d   : > { %v528_v24 = vadd.f32 %v473_v22, %v335_v16  ;;  %v536_v25 = vadd.f32 %v513_v23, %v343_v17  ;;  %1200 = vmatmul.mubr.msk.f32.vlgmr.msra.gmra.mrb[0].mxu1 (!%p1033_p9), %vm538_vm1, %v584_v41  ;;  %v578_v44 = vld [vmem:[#allocation2 + $0x18] sm:$0xff] (!%p1033_p9)  ;;  %v572_v15 = vld [vmem:[#allocation3 + $0x68] sm:$0xff] (!%p1033_p9)  ;;  %v563_v16 = vld [vmem:[#allocation3 + $0x20] sm:$0xff] (!%p1033_p9) }
 0x16e   : > { %546 = vst.msk [vmem:[#allocation2 + $0x38] sm:$0xff] %vm538_vm1, %v529_v20  ;;  %554 = vst.msk [vmem:[#allocation2 + $0x78] sm:$0xff] %vm538_vm1, %v537_v21  ;;  %v577_v42 = vld [vmem:[#allocation2 + $0x10] sm:$0xff] (!%p1033_p9)  ;;  %v586_v45 = vld [vmem:[#allocation2 + $0x58] sm:$0xff] (!%p1033_p9) }
 0x16f   : > { %545 = vst.msk [vmem:[#allocation2 + $0x30] sm:$0xff] %vm538_vm1, %v528_v24  ;;  %553 = vst.msk [vmem:[#allocation2 + $0x70] sm:$0xff] %vm538_vm1, %v536_v25  ;;  %v585_v43 = vld [vmem:[#allocation2 + $0x50] sm:$0xff] (!%p1033_p9)  ;;  %1190 = vmatprep.mubr.msk.f32.mxu0 (!%p1033_p9), %vm538_vm1, %v577_v42  ;;  %v571_v17 = vld [vmem:[#allocation3 + $0x60] sm:$0xff] (!%p1033_p9) }
 0x170   : > { %1202 = vmatprep.mubr.msk.f32.mxu1 %vm538_vm1, %v585_v43  ;;  %1191 = vmatmul.mubr.msk.f32.gmra.mrb[2].mxu0 %vm538_vm1, %v578_v44 }
 0x171   : > { %1203 = vmatmul.mubr.msk.f32.gmra.mrb[2].mxu1 %vm538_vm1, %v586_v45  ;;  %v580_v48 = vld [vmem:[#allocation2 + $0x28] sm:$0xff] }
 0x172   : > { %v579_v46 = vld [vmem:[#allocation2 + $0x20] sm:$0xff]  ;;  %v588_v49 = vld [vmem:[#allocation2 + $0x68] sm:$0xff] }
 0x173   : > { %v587_v47 = vld [vmem:[#allocation2 + $0x60] sm:$0xff]  ;;  %1193 = vmatprep.mubr.msk.f32.mxu0 %vm538_vm1, %v579_v46 }
 0x174   : > { %1205 = vmatprep.mubr.msk.f32.mxu1 %vm538_vm1, %v587_v47  ;;  %1194 = vmatmul.mubr.msk.f32.gmra.mrb[4].mxu0 %vm538_vm1, %v580_v48 }
 0x175   : > { %1206 = vmatmul.mubr.msk.f32.gmra.mrb[4].mxu1 %vm538_vm1, %v588_v49  ;;  %v582_v52 = vld [vmem:[#allocation2 + $0x38] sm:$0xff] }
 0x176   : > { %v581_v50 = vld [vmem:[#allocation2 + $0x30] sm:$0xff]  ;;  %v590_v53 = vld [vmem:[#allocation2 + $0x78] sm:$0xff] }
 0x177   : > { %v589_v51 = vld [vmem:[#allocation2 + $0x70] sm:$0xff]  ;;  %1196 = vmatprep.mubr.msk.f32.mxu0 %vm538_vm1, %v581_v50 }
 0x178   : > { %1208 = vmatprep.mubr.msk.f32.mxu1 %vm538_vm1, %v589_v51  ;;  %1197 = vmatmul.mubr.msk.f32.gmra.mrb[6].mxu0 %vm538_vm1, %v582_v52 }
 0x179   : > { %1209 = vmatmul.mubr.msk.f32.gmra.mrb[6].mxu1 %vm538_vm1, %v590_v53 }
 0x23f   : > { %v1189_v58 = vpop.f32.mrb[0].mxu0 }
 0x240   : > { %v1201_v59 = vpop.f32.mrb[0].mxu1  ;;  %v793_v60 = vadd.f32 %v1189_v58, %v560_v54  ;;  %v713_v62 = vpop.f32.mrb[1].mxu0 }
 0x241   : > { %v801_v61 = vadd.f32 %v1201_v59, %v568_v55  ;;  %v753_v63 = vpop.f32.mrb[1].mxu1  ;;  %v792_v0 = vadd.f32 %v713_v62, %v559_v56 }
 0x242   : > { %v800_v1 = vadd.f32 %v753_v63, %v567_v57  ;;  %809 = vst [vmem:[#allocation3 + $0x8] sm:$0xff] %v793_v60 }
 0x243   : > { %817 = vst [vmem:[#allocation3 + $0x48] sm:$0xff] %v801_v61  ;;  %808 = vst [vmem:[#allocation3] sm:$0xff] %v792_v0  ;;  %v1192_v6 = vpop.f32.mrb[2].mxu0 }
 0x244   : > { %816 = vst [vmem:[#allocation3 + $0x40] sm:$0xff] %v800_v1  ;;  %v1204_v7 = vpop.f32.mrb[2].mxu1  ;;  %v795_v8 = vadd.f32 %v1192_v6, %v562_v2  ;;  %v723_v10 = vpop.f32.mrb[3].mxu0 }
 0x245   : > { %v803_v9 = vadd.f32 %v1204_v7, %v570_v3  ;;  %v763_v11 = vpop.f32.mrb[3].mxu1  ;;  %v794_v12 = vadd.f32 %v723_v10, %v561_v4 }
 0x246   : > { %v802_v13 = vadd.f32 %v763_v11, %v569_v5  ;;  %811 = vst [vmem:[#allocation3 + $0x18] sm:$0xff] %v795_v8 }
 0x247   : > { %819 = vst [vmem:[#allocation3 + $0x58] sm:$0xff] %v803_v9  ;;  %810 = vst [vmem:[#allocation3 + $0x10] sm:$0xff] %v794_v12  ;;  %v1195_v18 = vpop.f32.mrb[4].mxu0 }
 0x248   : > { %818 = vst [vmem:[#allocation3 + $0x50] sm:$0xff] %v802_v13  ;;  %v1207_v19 = vpop.f32.mrb[4].mxu1  ;;  %v797_v20 = vadd.f32 %v1195_v18, %v564_v14  ;;  %v733_v22 = vpop.f32.mrb[5].mxu0 }
 0x249   : > { %v805_v21 = vadd.f32 %v1207_v19, %v572_v15  ;;  %v773_v23 = vpop.f32.mrb[5].mxu1  ;;  %v796_v24 = vadd.f32 %v733_v22, %v563_v16 }
 0x24a   : > { %v804_v25 = vadd.f32 %v773_v23, %v571_v17  ;;  %813 = vst [vmem:[#allocation3 + $0x28] sm:$0xff] %v797_v20 }
 0x24b   : > { %821 = vst [vmem:[#allocation3 + $0x68] sm:$0xff] %v805_v21  ;;  %812 = vst [vmem:[#allocation3 + $0x20] sm:$0xff] %v796_v24  ;;  %v1198_v30 = vpop.f32.mrb[6].mxu0 }
 0x24c   : > { %820 = vst [vmem:[#allocation3 + $0x60] sm:$0xff] %v804_v25  ;;  %v1210_v31 = vpop.f32.mrb[6].mxu1  ;;  %v799_v32 = vadd.f32 %v1198_v30, %v566_v26  ;;  %v743_v34 = vpop.f32.mrb[7].mxu0 }
 0x24d   : > { %v807_v33 = vadd.f32 %v1210_v31, %v574_v27  ;;  %v783_v35 = vpop.f32.mrb[7].mxu1  ;;  %v798_v36 = vadd.f32 %v743_v34, %v565_v28 }
 0x24e   : > { %v806_v37 = vadd.f32 %v783_v35, %v573_v29  ;;  %815 = vst [vmem:[#allocation3 + $0x38] sm:$0xff] %v799_v32 }
 0x24f   : > { %823 = vst [vmem:[#allocation3 + $0x78] sm:$0xff] %v807_v33  ;;  %814 = vst [vmem:[#allocation3 + $0x30] sm:$0xff] %v798_v36 }
 0x250   : > { %822 = vst [vmem:[#allocation3 + $0x70] sm:$0xff] %v806_v37 }
 0x251 PF: > { %p824_p5 = scmp.eq.s32.totalorder %s1556_s22, 2 }
 0x253   : > { %p825_p12 = pnand %p824_p5, %p555_p6 }
 0x254   : > { %v829_v38 = vld [vmem:[#allocation3] sm:$0xff] (!%p825_p12)  ;;  %s2032_s12 = sld [smem:[#allocation17_spill]] (!%p825_p12)  ;;  %v830_v40 = vld [vmem:[#allocation3 + $0x8] sm:$0xff] (!%p825_p12)  ;;  %v831_v43 = vld [vmem:[#allocation3 + $0x10] sm:$0xff] (!%p825_p12) }
 0x255   : > { %828 = sbr.rel (%p825_p12) target bundleno = 613 (0x265), region = 56  ;;  %v832_v44 = vld [vmem:[#allocation3 + $0x18] sm:$0xff] (!%p825_p12)  ;;  %v833_v45 = vld [vmem:[#allocation3 + $0x20] sm:$0xff] (!%p825_p12)  ;;  %v834_v49 = vld [vmem:[#allocation3 + $0x28] sm:$0xff] (!%p825_p12) }
 0x256   : > { %v835_v50 = vld [vmem:[#allocation3 + $0x30] sm:$0xff] (!%p825_p12)  ;;  %v836_v51 = vld [vmem:[#allocation3 + $0x38] sm:$0xff] (!%p825_p12)  ;;  %v837_v55 = vld [vmem:[#allocation3 + $0x40] sm:$0xff] (!%p825_p12) }
 0x257   : > { %v838_v56 = vld [vmem:[#allocation3 + $0x48] sm:$0xff] (!%p825_p12)  ;;  %v839_v57 = vld [vmem:[#allocation3 + $0x50] sm:$0xff] (!%p825_p12)  ;;  %v840_v61 = vld [vmem:[#allocation3 + $0x58] sm:$0xff] (!%p825_p12) }
 0x258   : > { %v841_v62 = vld [vmem:[#allocation3 + $0x60] sm:$0xff] (!%p825_p12)  ;;  %v842_v63 = vld [vmem:[#allocation3 + $0x68] sm:$0xff] (!%p825_p12)  ;;  %v843_v3 = vld [vmem:[#allocation3 + $0x70] sm:$0xff] (!%p825_p12) }
 0x259   : > { %v844_v4 = vld [vmem:[#allocation3 + $0x78] sm:$0xff] (!%p825_p12) }
 0x25a   : > { %v1050_v39 = vld [vmem:[%s2032_s12] ss:$0 sm:$0xff] (!%p825_p12) }
 0x25b   : > { %v852_v41 = vadd.f32 (!%p825_p12), %v1050_v39, %v829_v38  ;;  %v853_v42 = vadd.f32 (!%p825_p12), %v1050_v39, %v830_v40  ;;  %v854_v46 = vadd.f32 (!%p825_p12), %v1050_v39, %v831_v43  ;;  %v855_v47 = vadd.f32 (!%p825_p12), %v1050_v39, %v832_v44 }
 0x25c   : > { %v856_v48 = vadd.f32 %v1050_v39, %v833_v45  ;;  %v857_v52 = vadd.f32 %v1050_v39, %v834_v49  ;;  %v858_v53 = vadd.f32 %v1050_v39, %v835_v50  ;;  %v859_v54 = vadd.f32 %v1050_v39, %v836_v51 }
 0x25d   : > { %868 = vst [vmem:[%s1804_s5] sm:$0xff] %v852_v41  ;;  %869 = vst [vmem:[%s1804_s5 + $0x8] sm:$0xff] %v853_v42  ;;  %v860_v58 = vadd.f32 %v1050_v39, %v837_v55  ;;  %v861_v59 = vadd.f32 %v1050_v39, %v838_v56  ;;  %v862_v60 = vadd.f32 %v1050_v39, %v839_v57 }
 0x25e   : > { %870 = vst [vmem:[%s1804_s5 + $0x10] sm:$0xff] %v854_v46  ;;  %871 = vst [vmem:[%s1804_s5 + $0x18] sm:$0xff] %v855_v47  ;;  %v863_v0 = vadd.f32 %v1050_v39, %v840_v61  ;;  %v864_v1 = vadd.f32 %v1050_v39, %v841_v62  ;;  %v865_v2 = vadd.f32 %v1050_v39, %v842_v63 }
 0x25f   : > { %872 = vst [vmem:[%s1804_s5 + $0x20] sm:$0xff] %v856_v48  ;;  %873 = vst [vmem:[%s1804_s5 + $0x28] sm:$0xff] %v857_v52  ;;  %v866_v5 = vadd.f32 %v1050_v39, %v843_v3  ;;  %v867_v6 = vadd.f32 %v1050_v39, %v844_v4 }
 0x260   : > { %874 = vst [vmem:[%s1804_s5 + $0x30] sm:$0xff] %v858_v53  ;;  %875 = vst [vmem:[%s1804_s5 + $0x38] sm:$0xff] %v859_v54 }
 0x261   : > { %876 = vst [vmem:[%s1804_s5 + $0x40] sm:$0xff] %v860_v58  ;;  %877 = vst [vmem:[%s1804_s5 + $0x48] sm:$0xff] %v861_v59 }
 0x262   : > { %878 = vst [vmem:[%s1804_s5 + $0x50] sm:$0xff] %v862_v60  ;;  %879 = vst [vmem:[%s1804_s5 + $0x58] sm:$0xff] %v863_v0 }
 0x263   : > { %880 = vst [vmem:[%s1804_s5 + $0x60] sm:$0xff] %v864_v1  ;;  %881 = vst [vmem:[%s1804_s5 + $0x68] sm:$0xff] %v865_v2 }
 0x264   : > { %882 = vst [vmem:[%s1804_s5 + $0x70] sm:$0xff] %v866_v5  ;;  %883 = vst [vmem:[%s1804_s5 + $0x78] sm:$0xff] %v867_v6 }
 0x265 PF: > { %s2033_s21 = sld [smem:[#allocation11_spill]]  ;;  %s2034_s22 = sld [smem:[#allocation15_spill]] }
 0x266   : > { %s2035_s13 = sld [smem:[#allocation18_spill]]  ;;  %s898_s11 = sshll.u32 %s1804_s5, 4  ;;  %s1926_s11 = int_to_ptr.vmem [resolvable:$true] %s898_s11 }
 0x267   : > { %s1930_s10 = scalar_lea.sflag [#allocation6], %s271_s8  ;;  %s1438_s14 = scalar_lea.vmem %s1926_s11, 2048 }
 0x268   : > { %p1439_p13 = scmp.ne.s32.totalorder %s1926_s11, %s1438_s14  ;;  %s1584_s18 = smov [#allocation7]  }
 0x269   : > { %s1442_s23 = sshll.u32 %s1584_s18, 4  ;;  %s1443_s23 = int_to_ptr.vmem [resolvable:$false] %s1442_s23 }
 0x26a   : > { %s1444_s3 = scalar_lea.vmem %s1443_s23, 4096  ;;  %p1445_p11 = scmp.lt.s32.totalorder %s1926_s11, %s1443_s23 }
 0x26b   : > { %s1058_s7 = sshll.u32 %s2033_s21, 11  ;;  %p2036_p8 = scmp.ne.s32.totalorder %s2034_s22, 0 }
 0x26c   : > { %s1923_s29 = scalar_lea.hbm %s2035_s13, %s1058_s7  ;;  %p1446_p1 = scmp.lt.s32.totalorder %s1444_s3, %s1438_s14 }
 0x26d   : > { %p1440_p10 = pnand %p1439_p13, %p2036_p8 }
 0x26e   : > { %p1447_p4 = por %p1446_p1, %p1445_p11 }
 0x26f   : > { %p1441_p0 = pneg %p1440_p10 }
 0x271   : > { %p1448_p7 = pnand %p1447_p4, %p1441_p0 }
 0x273   : > { %1451 = shalt.err (!%p1448_p7)
}
 0x274   : > { %s1452_s8 = scalar_lea.hbm %s1923_s29, 2048  ;;  %s1456_s9 = scalar_lea.hbm %s2035_s13, 4096 }
 0x275   : > { %p1453_p2 = scmp.ne.s32.totalorder %s1923_s29, %s1452_s8  ;;  %p1457_p9 = scmp.lt.u32.totalorder %s1923_s29, %s2035_s13 }
 0x276   : > { %p1458_p5 = scmp.lt.u32.totalorder %s1456_s9, %s1452_s8  ;;  %p1460_p13 = scmp.lt.u32.totalorder %s1452_s8, %s1923_s29 }
 0x277   : > { %p1454_p3 = pnand %p1453_p2, %p2036_p8 }
 0x278   : > { %p1459_p12 = por %p1458_p5, %p1457_p9 }
 0x279   : > { %p1455_p6 = pneg %p1454_p3 }
 0x27a   : > { %p1461_p10 = por %p1460_p13, %p1459_p12 }
 0x27c   : > { %p1462_p0 = pnand %p1461_p10, %p1455_p6 }
 0x27e   : > { %1465 = shalt.err (!%p1462_p0)
}
 0x27f   : > { %s1585_s7 = smov 128   ;;  %s1586_s30 = smov 8  }
 0x280   : > { %1285 = dma.vmem_to_hbm [thread:$0]  (%p2036_p8), %s1926_s11, 2048, %s1923_s29, %s1930_s10, %s1585_s7, %s1585_s7, %s1586_s30  }
 0x281 PF: > { %s2037_s15 = sld [smem:[#allocation10_spill]]  ;;  %s2038_s14 = sld [smem:[#allocation16_spill]] }
 0x282   : > { %p1296_p11 = scmp.ge.s32.totalorder %s1576_s27, 2 }
 0x287   : > { %s913_s18 = sand.u32 1, %s2037_s15   ;;  %p2039_p1 = scmp.ne.s32.totalorder %s2038_s14, 0 }
 0x288   : > { %s914_s23 = scalar_lea.sflag [#allocation6], %s913_s18 }
 0x289   : > { %p1292_p4 = pnand %p1296_p11, %p2039_p1 }
 0x28b   : > { %1523 = dma.done.wait (!%p1292_p4), %s914_s23, 2048  }
 0x28c   : > { %1525 = vsyncadd (!%p1292_p4), %s914_s23, 4294965248  ;;  %s20_s27 = sadd.s32 1, %s1576_s27   ;;  %s2041_s29 = sld [smem:[#allocation12_spill]] }
 0x28d   : > { %p1959_p7 = scmp.ge.s32.totalorder %s20_s27, 14   ;;  %s2042_s11 = sld [smem:[#allocation13_spill]] }
 0x28e   : > { %s2043_s10 = sld [smem:[#allocation14_spill]]  ;;  %s2044_s15 = smov %s1532_s16 }
 0x28f   : > { %s2045_s16 = smov %s1536_s17  ;;  %s2046_s17 = smov %s1724_s28 }
 0x290   : > { %s2047_s18 = smov %s1544_s19  ;;  %s2048_s19 = smov %s1548_s20 }
 0x291   : > { %s2049_s20 = smov %s1729_s4  ;;  %s2050_s21 = smov %s1564_s24 }
 0x292   : > { %s2051_s22 = smov %s1568_s25  ;;  %s2052_s23 = smov %s1572_s26 }
 0x293   : > { %s2053_s24 = smov %s2041_s29  ;;  %s2054_s25 = smov %s2042_s11 }
 0x294   : > { %s2055_s26 = smov %s2043_s10  ;;  %19 = sbr.rel (!%p1959_p7) target bundleno = 13 (0xd), region = 103 }
 0x29b   :  { %919 = vsyncpa [#allocation5], 1 }
 0x29c   :  { %921 = vsyncpa [#allocation5 + $0x1], 1 }
 0x29d   :  { %922 = vsyncpa [#allocation6], 1 }
 0x29e   :  { %924 = vsyncpa [#allocation6 + $0x1], 1 }

</bundles_post_ra>
